<compile_context>
chip_gen: v7x
topology: tpu7x:2x2x1
jax: 0.10.0
libtpu: 0.0.40
codegen_flags: <defaults>
</compile_context>

<pallas_src>
import jax
import jax.numpy as jnp
from jax.experimental import pallas as pl
from jax.experimental.pallas import tpu as pltpu


def _classifier_kernel(w_ref, b_ref, x_ref, o_ref):
    """Fused Linear(2->2) + LogSoftmax, lane-dense (features x batch) layout.

    w_ref : (2, 2) SMEM  -- PyTorch layout: W[out, in]
    b_ref : (2,)   SMEM
    x_ref : (2, TB) VMEM -- row f = feature f, columns = batch lanes
    o_ref : (2, TB) VMEM -- log-softmax over the 2 feature rows
    """
    x = x_ref[...].astype(jnp.float32)          # (2, TB)
    x0 = x[0:1, :]                              # (1, TB)
    x1 = x[1:2, :]                              # (1, TB)

    # 6 parameters as SMEM scalars (no VMEM tile padding / extra DMA stream).
    w00 = w_ref[0, 0]
    w01 = w_ref[0, 1]
    w10 = w_ref[1, 0]
    w11 = w_ref[1, 1]
    b0 = b_ref[0]
    b1 = b_ref[1]

    # Linear layer on the VPU: z_j = x0*W[j,0] + x1*W[j,1] + b_j
    z0 = x0 * w00 + x1 * w01 + b0
    z1 = x0 * w10 + x1 * w11 + b1

    # Stable 2-class log-softmax via softplus(d) = max(d,0) + log1p(exp(-|d|))
    d = z1 - z0
    sp = jnp.maximum(d, 0.0) + jnp.log1p(jnp.exp(-jnp.abs(d)))
    o_ref[0:1, :] = (-sp).astype(o_ref.dtype)
    o_ref[1:2, :] = (d - sp).astype(o_ref.dtype)


def classifier_forward(x, weight, bias, *, max_tb=8192):
    """x: (B, 2) f32, weight: (2, 2) [out, in] (PyTorch layout), bias: (2,)."""
    B, in_f = x.shape
    out_f = weight.shape[0]
    assert in_f == 2 and out_f == 2, "Classifier is a Linear(2, 2) head"

    LANE = 128
    # Pad batch to a multiple of 128 lanes, then pick a lane tile TB (multiple
    # of 128, capped at max_tb) and round the padded batch up to a multiple of
    # TB so the grid tiles it exactly.
    b128 = pl.cdiv(B, LANE) * LANE
    tb = min(max_tb, b128)
    b_pad = pl.cdiv(b128, tb) * tb

    # Layout plumbing (plain JAX): batch onto the lane axis, zero-pad tail.
    # Padded columns produce finite log-softmax values and are sliced off.
    xt = jnp.zeros((in_f, b_pad), dtype=x.dtype).at[:, :B].set(x.T)

    grid = (b_pad // tb,)
    out_t = pl.pallas_call(
        _classifier_kernel,
        out_shape=jax.ShapeDtypeStruct((out_f, b_pad), x.dtype),
        grid=grid,
        in_specs=[
            pl.BlockSpec(memory_space=pltpu.MemorySpace.SMEM),   # weight (2,2)
            pl.BlockSpec(memory_space=pltpu.MemorySpace.SMEM),   # bias   (2,)
            pl.BlockSpec((in_f, tb), lambda i: (0, i)),          # x slab
        ],
        out_specs=pl.BlockSpec((out_f, tb), lambda i: (0, i)),
        compiler_params=pltpu.CompilerParams(
            dimension_semantics=("parallel",),                   # megacore on v7x
        ),
    )(weight, bias, xt)

    # Back to the PyTorch-facing (B, 2) layout.
    return out_t[:, :B].T


def reference_forward(x, weight, bias):
    z = x @ weight.T + bias
    return jax.nn.log_softmax(z, axis=1)


if __name__ == "__main__":
    key = jax.random.PRNGKey(0)
    kx, kw, kb = jax.random.split(key, 3)

    # Small shapes consistent with the module: Linear(2, 2) head.
    B, IN, OUT = 8, 2, 2

    x = jax.random.normal(kx, (B, IN), dtype=jnp.float32)

    # Deterministic parameter init mimicking nn.Linear's U(-1/sqrt(in), 1/sqrt(in))
    bound = 1.0 / jnp.sqrt(jnp.float32(IN))
    weight = jax.random.uniform(kw, (OUT, IN), minval=-bound, maxval=bound,
                                dtype=jnp.float32)
    bias = jax.random.uniform(kb, (OUT,), minval=-bound, maxval=bound,
                              dtype=jnp.float32)

    out = classifier_forward(x, weight, bias)
    out = jax.block_until_ready(out)

    ref = reference_forward(x, weight, bias)
    assert out.shape == (B, OUT)
    assert jnp.allclose(out, ref, atol=1e-5, rtol=1e-5), (
        f"mismatch: max abs err = {jnp.max(jnp.abs(out - ref))}"
    )

    print("KERNEL_OK")
</pallas_src>

<mosaic_0001>
module attributes {stable_mosaic.version = 11 : i64} {
  func.func @_classifier_kernel(%arg0: i32, %arg1: memref<2x2xf32, #tpu.memory_space<smem>>, %arg2: memref<2xf32, #tpu.memory_space<smem>>, %arg3: memref<2x128xf32, #tpu.memory_space<vmem>>, %arg4: memref<2x128xf32, #tpu.memory_space<vmem>>) attributes {dimension_semantics = [#tpu.dimension_semantics<parallel>], iteration_bounds = array<i64: 1>, scalar_prefetch = 0 : i64, scratch_operands = 0 : i64, tpu.core_type = #tpu.core_type<tc>, window_params = [{transform_indices = @transform_0, window_bounds = array<i64: 2, 2>}, {transform_indices = @transform_1, window_bounds = array<i64: 2>}, {transform_indices = @transform_2, window_bounds = array<i64: 2, 128>}, {transform_indices = @transform_3, window_bounds = array<i64: 2, 128>}]} {
    %c0 = arith.constant 0 : index
    %c0_0 = arith.constant 0 : index
    %0 = vector.load %arg3[%c0, %c0_0] : memref<2x128xf32, #tpu.memory_space<vmem>>, vector<2x128xf32>
    %1 = vector.extract_strided_slice %0 {offsets = [0, 0], sizes = [1, 128], strides = [1, 1]} : vector<2x128xf32> to vector<1x128xf32>
    %2 = vector.extract_strided_slice %0 {offsets = [1, 0], sizes = [1, 128], strides = [1, 1]} : vector<2x128xf32> to vector<1x128xf32>
    %c0_1 = arith.constant 0 : index
    %c0_2 = arith.constant 0 : index
    %3 = memref.load %arg1[%c0_1, %c0_2] : memref<2x2xf32, #tpu.memory_space<smem>>
    %c0_3 = arith.constant 0 : index
    %c1 = arith.constant 1 : index
    %4 = memref.load %arg1[%c0_3, %c1] : memref<2x2xf32, #tpu.memory_space<smem>>
    %c1_4 = arith.constant 1 : index
    %c0_5 = arith.constant 0 : index
    %5 = memref.load %arg1[%c1_4, %c0_5] : memref<2x2xf32, #tpu.memory_space<smem>>
    %c1_6 = arith.constant 1 : index
    %c1_7 = arith.constant 1 : index
    %6 = memref.load %arg1[%c1_6, %c1_7] : memref<2x2xf32, #tpu.memory_space<smem>>
    %c0_8 = arith.constant 0 : index
    %7 = memref.load %arg2[%c0_8] : memref<2xf32, #tpu.memory_space<smem>>
    %c1_9 = arith.constant 1 : index
    %8 = memref.load %arg2[%c1_9] : memref<2xf32, #tpu.memory_space<smem>>
    %9 = vector.broadcast %3 : f32 to vector<1x128xf32>
    %10 = arith.mulf %1, %9 : vector<1x128xf32>
    %11 = vector.broadcast %4 : f32 to vector<1x128xf32>
    %12 = arith.mulf %2, %11 : vector<1x128xf32>
    %13 = arith.addf %10, %12 : vector<1x128xf32>
    %14 = vector.broadcast %7 : f32 to vector<1x128xf32>
    %15 = arith.addf %13, %14 : vector<1x128xf32>
    %16 = vector.broadcast %5 : f32 to vector<1x128xf32>
    %17 = arith.mulf %1, %16 : vector<1x128xf32>
    %18 = vector.broadcast %6 : f32 to vector<1x128xf32>
    %19 = arith.mulf %2, %18 : vector<1x128xf32>
    %20 = arith.addf %17, %19 : vector<1x128xf32>
    %21 = vector.broadcast %8 : f32 to vector<1x128xf32>
    %22 = arith.addf %20, %21 : vector<1x128xf32>
    %23 = arith.subf %22, %15 : vector<1x128xf32>
    %cst = arith.constant 0.000000e+00 : f32
    %24 = vector.broadcast %cst : f32 to vector<1x128xf32>
    %25 = arith.maximumf %23, %24 : vector<1x128xf32>
    %26 = math.absf %23 : vector<1x128xf32>
    %cst_10 = arith.constant 0.000000e+00 : f32
    %27 = vector.broadcast %cst_10 : f32 to vector<1x128xf32>
    %28 = arith.subf %27, %26 : vector<1x128xf32>
    %29 = math.exp %28 : vector<1x128xf32>
    %30 = math.log1p %29 : vector<1x128xf32>
    %31 = arith.addf %25, %30 : vector<1x128xf32>
    %cst_11 = arith.constant 0.000000e+00 : f32
    %32 = vector.broadcast %cst_11 : f32 to vector<1x128xf32>
    %33 = arith.subf %32, %31 : vector<1x128xf32>
    %c0_12 = arith.constant 0 : index
    %c0_13 = arith.constant 0 : index
    %34 = vector.load %arg4[%c0_12, %c0_13] : memref<2x128xf32, #tpu.memory_space<vmem>>, vector<1x128xf32>
    tpu.vector_store %arg4[%c0_12, %c0_13], %33 {strides = array<i32>} : memref<2x128xf32, #tpu.memory_space<vmem>>, vector<1x128xf32>,
    %35 = arith.subf %23, %31 : vector<1x128xf32>
    %c1_14 = arith.constant 1 : index
    %c0_15 = arith.constant 0 : index
    %36 = vector.load %arg4[%c1_14, %c0_15] : memref<2x128xf32, #tpu.memory_space<vmem>>, vector<1x128xf32>
    tpu.vector_store %arg4[%c1_14, %c0_15], %35 {strides = array<i32>} : memref<2x128xf32, #tpu.memory_space<vmem>>, vector<1x128xf32>,
    return
  }
  func.func @transform_0(%arg0: i32) -> (i32, i32) {
    %c0_i32 = arith.constant 0 : i32
    %c0_i32_0 = arith.constant 0 : i32
    %c0_i32_1 = arith.constant 0 : i32
    return %c0_i32, %c0_i32_0 : i32, i32
  }
  func.func @transform_1(%arg0: i32) -> i32 {
    %c0_i32 = arith.constant 0 : i32
    %c0_i32_0 = arith.constant 0 : i32
    return %c0_i32 : i32
  }
  func.func @transform_2(%arg0: i32) -> (i32, i32) {
    %c0_i32 = arith.constant 0 : i32
    %c0_i32_0 = arith.constant 0 : i32
    return %c0_i32, %arg0 : i32, i32
  }
  func.func @transform_3(%arg0: i32) -> (i32, i32) {
    %c0_i32 = arith.constant 0 : i32
    %c0_i32_0 = arith.constant 0 : i32
    return %c0_i32, %arg0 : i32, i32
  }
}

</mosaic_0001>

<bundles_post_ra>
// kernel: tpu_custom_call.1
= control target key start
LH: loop header
LB: loop body
LE: loop exit
PB: predicated region body
PF: predicated region fallthrough
CT: control target
= control target key end

     0   :  { %8 = vsyncpa [#allocation4], 0  ;;  %s215_s0 = inlined_call_operand.hbm [shape: f32[2,2], index: 0, kind: input, shape index: {}]   ;;  %s216_s1 = inlined_call_operand.vmem [shape: f32[2], index: 1, kind: input, shape index: {}]   ;;  %s217_s2 = inlined_call_operand.vmem [shape: f32[2,128], index: 2, kind: input, shape index: {}]   ;;  %s218_s3 = inlined_call_operand.hbm [shape: f32[2,128], index: 3, kind: output, shape index: {}]  }
   0x1   :  { %9 = vsyncpa [#allocation5], 0 }
   0x2   :  { %10 = vsyncpa [#allocation3], 0  ;;  %s25_s14 = sshll.u32 %s216_s1, 4  ;;  %s112_s17 = scalar_lea.hbm %s215_s0, 32  ;;  %s26_s14 = int_to_ptr.vmem [resolvable:$true] %s25_s14 }
   0x3   :  { %p113_p0 = scmp.ne.s32.totalorder %s215_s0, %s112_s17  ;;  %p116_p1 = scmp.lt.u32.totalorder %s112_s17, %s215_s0 }
   0x5   :  { %p118_p2 = pnand %p116_p1, %p113_p0 }
   0x7   :  { %121 = shalt.err (!%p118_p2)
}
   0x8   :  { %s162_s22 = smov [#allocation2]   ;;  %s122_s1 = scalar_lea.vmem %s26_s14, 16 }
   0x9   :  { %18 = dma.hbm_to_smem %s215_s0, 32, %s162_s22, [#allocation4]  }
   0xa   :  { %p123_p3 = scmp.ne.s32.totalorder %s26_s14, %s122_s1  ;;  %p127_p4 = scmp.lt.s32.totalorder %s26_s14, %s26_s14 }
   0xb   :  { %p128_p5 = scmp.lt.s32.totalorder %s122_s1, %s122_s1 }
   0xd   :  { %p129_p6 = por %p128_p5, %p127_p4 }
   0xf   :  { %p130_p7 = pnand %p129_p6, %p123_p3 }
  0x11   :  { %133 = shalt.err (!%p130_p7)
}
  0x12   :  { %s163_s25 = smov [#allocation6]  }
  0x13   :  { %28 = dma.vmem_to_smem %s26_s14, 16, %s163_s25, [#allocation5]  }
  0x14   :  { %156 = dma.done.wait [#allocation4], 32  }
  0x15   :  { %157 = vsyncadd [#allocation4], 4294967264 }
  0x16   :  { %158 = dma.done.wait [#allocation5], 16  }
  0x17   :  { %159 = vsyncadd [#allocation5], 4294967280 }
  0x18   :  { %37 = sfence }
  0x19   :  { %s39_s26 = sld [smem:[#allocation2]]  ;;  %s101_s27 = sld [smem:[#allocation2 + $0x1]]  ;;  %v38_v0 = vld [vmem:[%s217_s2] sm:$0x3] }
  0x1a   :  { %s102_s28 = sld [smem:[#allocation2 + $0x80]]  ;;  %s103_s29 = sld [smem:[#allocation2 + $0x81]] }
  0x1b   :  { %s43_s0 = sld [smem:[#allocation6]]  ;;  %s104_s30 = sld [smem:[#allocation6 + $0x1]] }
  0x1c   :  { %s164_s2 = smov [#allocation7]  }
  0x1d   :  { %s91_s6 = sshll.u32 %s164_s2, 4  ;;  %s92_s6 = int_to_ptr.vmem [resolvable:$true] %s91_s6 }
  0x1e   :  { %s134_s7 = scalar_lea.vmem %s92_s6, 32  ;;  %p139_p9 = scmp.lt.s32.totalorder %s92_s6, %s92_s6 }
  0x1f   :  { %v45_v1 = vstv %s39_s26  ;;  %v47_v2 = vstv %s101_s27  ;;  %p135_p8 = scmp.ne.s32.totalorder %s92_s6, %s134_s7  ;;  %p140_p10 = scmp.lt.s32.totalorder %s134_s7, %s134_s7 }
  0x20   :  { %v46_v3 = vmul.f32 %v45_v1, %v38_v0  ;;  %v48_v4 = vmul.f32 %v47_v2, %v38_v0  ;;  %v55_v5 = vstv %s102_s28  ;;  %v57_v6 = vstv %s103_s29 }
  0x21   :  { %v56_v7 = vmul.f32 %v55_v5, %v38_v0  ;;  %v58_v8 = vmul.f32 %v57_v6, %v38_v0  ;;  %v53_v10 = vstv %s43_s0  ;;  %v63_v13 = vstv %s104_s30  ;;  %p141_p11 = por %p140_p10, %p139_p9 }
  0x22   :  { %v50_v9 = vrot.slane %v48_v4, 1 }
  0x23   :  { %v60_v11 = vrot.slane %v58_v8, 1  ;;  %p142_p12 = pnand %p141_p11, %p135_p8 }
  0x24   :  { %v52_v12 = vadd.f32 %v50_v9, %v46_v3 }
  0x25   :  { %v62_v14 = vadd.f32 %v60_v11, %v56_v7 }
  0x26   :  { %v54_v15 = vadd.f32 %v53_v10, %v52_v12 }
  0x27   :  { %v64_v16 = vadd.f32 %v63_v13, %v62_v14 }
  0x29   :  { %v65_v17 = vsub.f32 %v64_v16, %v54_v15 }
  0x2b   :  { %v67_v18 = vand.u32 2147483647, %v65_v17  ;;  %v66_v28 = vmax.f32 %v65_v17, 0.0 }
  0x2d   :  { %v68_v19 = vsub.f32 0.0, %v67_v18 }
  0x2f   :  { %v69_v20 = vmul.f32 1.442695, %v68_v19 }
  0x31   :  { %108 = vpow2.f32 %v69_v20 }
  0x3b   :  { %v109_v21 = vpop.eup %108 }
  0x3c   :  { %v71_v22 = vadd.f32 1.0, %v109_v21  ;;  %v74_v23 = vmul.f32 -0.5, %v109_v21  ;;  %v77_v25 = vand.u32 2147483647, %v109_v21 }
  0x3e   :  { %110 = vlog2.f32 %v71_v22  ;;  %v75_v24 = vadd.f32 1.0, %v74_v23  ;;  %vm78_vm0 = vcmp.lt.f32.partialorder %v77_v25, 0.0004427343 }
  0x40   :  { %v76_v26 = vmul.f32 %v109_v21, %v75_v24 }
  0x48   :  { %v111_v27 = vpop.eup %110 }
  0x49   :  { %v73_v29 = vmul.f32 0.6931472, %v111_v27 }
  0x4b   :  { %v79_v30 = vsel %vm78_vm0, %v76_v26, %v73_v29 }
  0x4c   :  { %v80_v31 = vadd.f32 %v79_v30, %v66_v28 }
  0x4e   :  { %v81_v32 = vsub.f32 0.0, %v80_v31  ;;  %v83_v33 = vsub.f32 %v65_v17, %v80_v31 }
  0x50   :  { %82 = vst [vmem:[#allocation7] sm:$0x1] %v81_v32  ;;  %84 = vst [vmem:[#allocation7 + $0x1] sm:$0x1] %v83_v33 }
  0x51   :  { %145 = shalt.err (!%p142_p12)
}
  0x52   :  { %s146_s10 = scalar_lea.hbm %s218_s3, 32 }
  0x53   :  { %p147_p13 = scmp.ne.s32.totalorder %s218_s3, %s146_s10  ;;  %p150_p0 = scmp.lt.u32.totalorder %s146_s10, %s218_s3 }
  0x55   :  { %p152_p1 = pnand %p150_p0, %p147_p13 }
  0x57   :  { %155 = shalt.err (!%p152_p1)
}
  0x58   :  { %94 = dma.vmem_to_hbm [thread:$0]  %s92_s6, 32, %s218_s3, [#allocation3]  }
  0x59   :  { %160 = dma.done.wait [#allocation3], 32  }
  0x5a   :  { %161 = vsyncadd [#allocation3], 4294967264 }
  0x5b   :  { %98 = vsyncpa [#allocation3], 1 }
  0x5c   :  { %99 = vsyncpa [#allocation4], 1 }
  0x5d   :  { %100 = vsyncpa [#allocation5], 1 }

</bundles_post_ra>
